<compile_context>
chip_gen: v5e
topology: v5e:2x2
jax: 0.10.0
libtpu: 0.0.40
codegen_flags: <defaults>
</compile_context>

<pallas_src>
import functools

import jax
import jax.numpy as jnp
from jax.experimental import pallas as pl
from jax.experimental.pallas import tpu as pltpu


def _cdiv(a, b):
    return -(-a // b)


def _round_up(x, m):
    return _cdiv(x, m) * m


def _ce_ls_kernel(pred_ref, target_ref, out_ref, *, confidence, eps_over_c,
                  num_valid, tb):
    i = pl.program_id(0)

    x_native = pred_ref[...]                                    # (TB, C) native dtype
    TB, C = x_native.shape
    tgt = target_ref[...]                                       # (TB, 1) int32

    # Row max in the native dtype (bf16 VALU on v6e/v7x), then a single upcast.
    m = jnp.max(x_native, axis=-1, keepdims=True).astype(jnp.float32)   # (TB, 1)
    x = x_native.astype(jnp.float32)                            # (TB, C) f32

    # Numerically stable log-sum-exp per row.
    lse = m + jnp.log(jnp.sum(jnp.exp(x - m), axis=-1, keepdims=True))  # (TB, 1)

    # Fused weighted reduction: conf*x[target] + eps*sum_c(x)
    #                         = sum_c( (eps + conf*onehot_c(target)) * x )
    cls = jax.lax.broadcasted_iota(jnp.int32, (TB, C), 1)
    w = jnp.where(cls == tgt, confidence + eps_over_c, eps_over_c)
    wx = jnp.sum(w * x, axis=-1, keepdims=True)                 # (TB, 1)

    loss_row = lse - wx                                         # (TB, 1)

    # Mask ragged-tail rows (partial last block reads undefined HBM data).
    # Must stay a SELECT so NaN/Inf from garbage rows cannot leak.
    row = i * tb + jax.lax.broadcasted_iota(jnp.int32, (TB, 1), 0)
    out_ref[...] = jnp.where(row < num_valid, loss_row, 0.0)


def cross_entropy_label_smoothing(pred, target, smoothing=0.1, block_rows=None):
    """pred: [B, C] logits (any float dtype); target: [B] int class indices.

    Returns the scalar smoothed-CE loss (float32), identical to the PyTorch
    module.  Out-of-range target indices silently contribute x_t = 0 instead
    of erroring like PyTorch's scatter_.
    """
    B, C = pred.shape
    itemsize = jnp.dtype(pred.dtype).itemsize

    # dtype-dependent sublane multiple: 8 (f32), 16 (bf16), 32 (int8/fp8).
    sub = max(8, 32 // itemsize)

    if block_rows is None:
        # Per-step VMEM footprint ~= 2*tb*C*itemsize (double-buffered input)
        #                          + ~4*tb*C*4      (f32/int32 temporaries).
        # <= ~10 MiB fits v5e's 16 MiB default scoped VMEM and leaves headroom
        # on v7x's 64 MiB per-TC; ~2 MiB-class input tiles already reach ~85%
        # of the HBM roofline, so nothing is lost by staying small.
        budget = 10 * 1024 * 1024
        try:  # generation-aware cap (v7x has only 64 MiB per TC)
            budget = min(budget, pltpu.get_tpu_info().vmem_capacity_bytes // 8)
        except Exception:
            pass
        tb = budget // max(1, C * (2 * itemsize + 16))
        tb = max(sub, min(1024, (tb // sub) * sub))
        # Keep >= ~4 grid steps so double-buffering overlaps DMA with compute
        # and both TensorCores get work on v7x.
        tb = min(tb, max(sub, _round_up(_cdiv(B, 4), sub)))
    else:
        tb = max(sub, _round_up(block_rows, sub))
    tb = min(tb, _round_up(B, sub))

    # No padding of the logits: ragged last block + in-kernel row mask.
    grid = _cdiv(B, tb)

    tgt2d = target.reshape(B, 1).astype(jnp.int32)

    kernel = functools.partial(
        _ce_ls_kernel,
        confidence=float(1.0 - smoothing),
        eps_over_c=float(smoothing) / C,
        num_valid=B,
        tb=tb,
    )

    cost = pl.CostEstimate(
        flops=6 * B * C,                       # max, sub, sum, weighted sum, ...
        transcendentals=B * C + B,             # exp per element + log per row
        bytes_accessed=B * C * itemsize + B * 4 + B * 4,
    )

    per_row = pl.pallas_call(
        kernel,
        out_shape=jax.ShapeDtypeStruct((B, 1), jnp.float32),
        grid_spec=pltpu.PrefetchScalarGridSpec(
            num_scalar_prefetch=0,
            grid=(grid,),
            in_specs=[
                pl.BlockSpec((tb, C), lambda i: (i, 0)),   # logits (native dtype)
                pl.BlockSpec((tb, 1), lambda i: (i, 0)),   # targets
            ],
            out_specs=pl.BlockSpec((tb, 1), lambda i: (i, 0)),  # per-row losses
        ),
        compiler_params=pltpu.CompilerParams(
            dimension_semantics=("parallel",),  # independent blocks -> megacore safe
        ),
        cost_estimate=cost,
    )(pred, tgt2d)

    # Tiny epilogue: mean over the true batch (masked rows are zero / dropped).
    return jnp.sum(per_row) * (1.0 / B)


def _reference(pred, target, smoothing=0.1):
    logp = jax.nn.log_softmax(pred.astype(jnp.float32), axis=-1)
    C = pred.shape[-1]
    one_hot = jax.nn.one_hot(target, C, dtype=jnp.float32)
    true_dist = one_hot * (1.0 - smoothing) + smoothing / C
    return jnp.mean(jnp.sum(-true_dist * logp, axis=-1))


if __name__ == "__main__":
    key = jax.random.PRNGKey(0)
    k1, k2, k3, k4, k5, k6 = jax.random.split(key, 6)

    # Small shapes consistent with (logits, class-index) forward.
    B, C = 8, 16
    pred = jax.random.normal(k1, (B, C), dtype=jnp.float32)
    target = jax.random.randint(k2, (B,), 0, C, dtype=jnp.int32)
    loss = cross_entropy_label_smoothing(pred, target, smoothing=0.1)
    jax.block_until_ready(loss)
    ref = _reference(pred, target, smoothing=0.1)
    assert jnp.allclose(loss, ref, atol=1e-5, rtol=1e-5), (loss, ref)

    # Exercises batch tiling (grid=3) with a ragged, unpadded last block.
    B2, C2 = 20, 160
    pred2 = jax.random.normal(k3, (B2, C2), dtype=jnp.float32)
    target2 = jax.random.randint(k4, (B2,), 0, C2, dtype=jnp.int32)
    loss2 = cross_entropy_label_smoothing(pred2, target2, smoothing=0.1, block_rows=8)
    jax.block_until_ready(loss2)
    ref2 = _reference(pred2, target2, smoothing=0.1)
    assert jnp.allclose(loss2, ref2, atol=1e-5, rtol=1e-5), (loss2, ref2)

    # bf16 logits: native-dtype max, 16-row sublane multiple, ragged tail.
    B3, C3 = 24, 256
    pred3 = jax.random.normal(k5, (B3, C3), dtype=jnp.bfloat16)
    target3 = jax.random.randint(k6, (B3,), 0, C3, dtype=jnp.int32)
    loss3 = cross_entropy_label_smoothing(pred3, target3, smoothing=0.1)
    jax.block_until_ready(loss3)
    ref3 = _reference(pred3, target3, smoothing=0.1)
    assert jnp.allclose(loss3, ref3, atol=1e-4, rtol=1e-4), (loss3, ref3)

    print("KERNEL_OK")
</pallas_src>

<mosaic_0001>
module attributes {stable_mosaic.version = 11 : i64} {
  func.func @_ce_ls_kernel(%arg0: i32, %arg1: memref<8x16xf32, #tpu.memory_space<vmem>>, %arg2: memref<8x1xi32, #tpu.memory_space<vmem>>, %arg3: memref<8x1xf32, #tpu.memory_space<vmem>>) attributes {dimension_semantics = [#tpu.dimension_semantics<parallel>], iteration_bounds = array<i64: 1>, scalar_prefetch = 0 : i64, scratch_operands = 0 : i64, tpu.core_type = #tpu.core_type<tc>, window_params = [{transform_indices = @transform_0, window_bounds = array<i64: 8, 16>}, {transform_indices = @transform_1, window_bounds = array<i64: 8, 1>}, {transform_indices = @transform_2, window_bounds = array<i64: 8, 1>}]} {
    %c0 = arith.constant 0 : index
    %c0_0 = arith.constant 0 : index
    %0 = vector.load %arg1[%c0, %c0_0] : memref<8x16xf32, #tpu.memory_space<vmem>>, vector<8x16xf32>
    %c0_1 = arith.constant 0 : index
    %c0_2 = arith.constant 0 : index
    %1 = vector.load %arg2[%c0_1, %c0_2] : memref<8x1xi32, #tpu.memory_space<vmem>>, vector<8x1xi32>
    %cst = arith.constant dense<0xFF800000> : vector<8xf32>
    %2 = vector.multi_reduction <maximumf>, %0, %cst [1] : vector<8x16xf32> to vector<8xf32>
    %3 = vector.shape_cast %2 : vector<8xf32> to vector<8x1xf32>
    %4 = vector.broadcast %3 : vector<8x1xf32> to vector<8x16xf32>
    %5 = arith.subf %0, %4 : vector<8x16xf32>
    %6 = math.exp %5 : vector<8x16xf32>
    %cst_3 = arith.constant dense<0.000000e+00> : vector<8xf32>
    %7 = vector.multi_reduction <add>, %6, %cst_3 [1] : vector<8x16xf32> to vector<8xf32>
    %8 = vector.shape_cast %7 : vector<8xf32> to vector<8x1xf32>
    %9 = math.log %8 : vector<8x1xf32>
    %10 = arith.addf %3, %9 : vector<8x1xf32>
    %11 = tpu.iota {dimensions = array<i32: 1>} : vector<8x16xi32>
    %12 = vector.broadcast %1 : vector<8x1xi32> to vector<8x16xi32>
    %13 = arith.cmpi eq, %11, %12 : vector<8x16xi32>
    %cst_4 = arith.constant 9.062500e-01 : f32
    %cst_5 = arith.constant 6.250000e-03 : f32
    %14 = vector.broadcast %cst_4 : f32 to vector<8x16xf32>
    %15 = vector.broadcast %cst_5 : f32 to vector<8x16xf32>
    %16 = arith.select %13, %14, %15 : vector<8x16xi1>, vector<8x16xf32>
    %17 = arith.mulf %16, %0 : vector<8x16xf32>
    %cst_6 = arith.constant dense<0.000000e+00> : vector<8xf32>
    %18 = vector.multi_reduction <add>, %17, %cst_6 [1] : vector<8x16xf32> to vector<8xf32>
    %19 = vector.shape_cast %18 : vector<8xf32> to vector<8x1xf32>
    %20 = arith.subf %10, %19 : vector<8x1xf32>
    %c8_i32 = arith.constant 8 : i32
    %21 = arith.muli %arg0, %c8_i32 : i32
    %22 = tpu.iota {dimensions = array<i32: 0>} : vector<8x1xi32>
    %23 = vector.broadcast %21 : i32 to vector<8x1xi32>
    %24 = arith.addi %23, %22 : vector<8x1xi32>
    %c8_i32_7 = arith.constant 8 : i32
    %25 = vector.broadcast %c8_i32_7 : i32 to vector<8x1xi32>
    %26 = arith.cmpi slt, %24, %25 : vector<8x1xi32>
    %cst_8 = arith.constant 0.000000e+00 : f32
    %27 = vector.broadcast %cst_8 : f32 to vector<8x1xf32>
    %28 = arith.select %26, %20, %27 : vector<8x1xi1>, vector<8x1xf32>
    %c0_9 = arith.constant 0 : index
    %c0_10 = arith.constant 0 : index
    %29 = vector.load %arg3[%c0_9, %c0_10] : memref<8x1xf32, #tpu.memory_space<vmem>>, vector<8x1xf32>
    tpu.vector_store %arg3[%c0_9, %c0_10], %28 {strides = array<i32>} : memref<8x1xf32, #tpu.memory_space<vmem>>, vector<8x1xf32>,
    return
  }
  func.func @transform_0(%arg0: i32) -> (i32, i32) {
    %c0_i32 = arith.constant 0 : i32
    %c0_i32_0 = arith.constant 0 : i32
    return %arg0, %c0_i32 : i32, i32
  }
  func.func @transform_1(%arg0: i32) -> (i32, i32) {
    %c0_i32 = arith.constant 0 : i32
    %c0_i32_0 = arith.constant 0 : i32
    return %arg0, %c0_i32 : i32, i32
  }
  func.func @transform_2(%arg0: i32) -> (i32, i32) {
    %c0_i32 = arith.constant 0 : i32
    %c0_i32_0 = arith.constant 0 : i32
    return %arg0, %c0_i32 : i32, i32
  }
}

</mosaic_0001>

<bundles_post_ra>
// kernel: tpu_custom_call.1
= control target key start
LH: loop header
LB: loop body
LE: loop exit
PB: predicated region body
PF: predicated region fallthrough
CT: control target
= control target key end

     0   :  { %vm13_vm0 = vcmask 130048   ;;  %v58_v1 = vmov 0   ;;  %v26_v9 = vlaneseq  ;;  %v59_v12 = vmov 0.00625   ;;  %s87_s0 = inlined_call_operand.vmem [shape: f32[8,16], index: 0, kind: input, shape index: {}]   ;;  %s88_s1 = inlined_call_operand.vmem [shape: s32[8,1], index: 1, kind: input, shape index: {}]   ;;  %s89_s2 = inlined_call_operand.vmem [shape: f32[8,1], index: 2, kind: output, shape index: {}]  }
   0x1   :  { %v11_v0 = vld [vmem:[%s87_s0] sm:$0xff]  ;;  %53 = vset.pattern.permute.xlu0 %v58_v1  ;;  %vm45_vm2 = vcmask 7168  }
   0x2   :  { %v14_v2 = vsel %vm13_vm0, %v11_v0, -inf  ;;  %v12_v3 = vld [vmem:[%s88_s1] sm:$0xff]  ;;  %v27_v10 = vand.u32 127, %v26_v9 }
   0x3   :  { %15 = vmax.xlane.f32.xlu0 %v14_v2 }
  0x17   :  { %29 = vperm.xlu0 %53, %v12_v3  }
  0x76   :  { %v16_v4 = vpop.xlane.xlu0 %15 }
  0x77   :  { %v17_v5 = vsub.f32 %v11_v0, %v16_v4 }
  0x79   :  { %v18_v6 = vmul.f32 1.442695, %v17_v5 }
  0x7b   :  { %54 = vpow2.f32 %v18_v6 }
  0x81   :  { %v55_v7 = vpop.eup %54 }
  0x82   :  { %v20_v8 = vsel %vm13_vm0, %v55_v7, 0.0 }
  0x83   :  { %21 = vadd.xlane.f32.xlu1 %v20_v8 }
  0x89   :  { %v30_v11 = vpop.permute.xlu0 %29 }
  0x8a   :  { %vm31_vm1 = vcmp.eq.s32.totalorder %v27_v10, %v30_v11 }
  0x8b   :  { %v32_v13 = vsel %vm31_vm1, 0.90625, %v59_v12 }
  0x8c   :  { %v33_v14 = vmul.f32 %v32_v13, %v11_v0 }
  0x8e   :  { %v34_v15 = vsel %vm13_vm0, %v33_v14, 0.0 }
  0x8f   :  { %35 = vadd.xlane.f32.xlu1 %v34_v15 }
  0xf6   :  { %v22_v16 = vpop.xlane.xlu1 %21 }
  0xf7   :  { %56 = vlog2.f32 %v22_v16 }
  0xfd   :  { %v57_v17 = vpop.eup %56 }
  0xfe   :  { %v24_v18 = vmul.f32 0.6931472, %v57_v17 }
 0x100   :  { %v25_v19 = vadd.f32 %v24_v18, %v16_v4 }
 0x102   :  { %v36_v20 = vpop.xlane.xlu1 %35 }
 0x103   :  { %v37_v21 = vsub.f32 %v25_v19, %v36_v20 }
 0x105   :  { %46 = vst.msk [vmem:[%s89_s2] sm:$0xff] %vm45_vm2, %v37_v21 }

</bundles_post_ra>
